<compile_context>
chip_gen: v5e
topology: v5e:2x2
jax: 0.10.0
libtpu: 0.0.40
codegen_flags: <defaults>
</compile_context>

<pallas_src>
import functools

import jax
import jax.numpy as jnp
from jax import lax
from jax.experimental import pallas as pl
from jax.experimental.pallas import tpu as pltpu


def _round_up(x, m):
    return ((x + m - 1) // m) * m


def _make_kernel(C, PS, Pt, patch_stride, s_bias, inv_seq, inv_ps1, inv_c1, G):
    two_ps = 2 * PS
    W = G * two_ps  # lanes handled per channel-group (>= 128 whenever 2*PS < 128)

    def boxcoder_kernel(rel_ref, pts_ref, bound_ref):
        # rel_ref   : (Bt, Pt, 2*C)      f32  [dx, ds] interleaved along lanes
        # pts_ref   : (Bt, Pt, C*2*PS)   f32  [x, y] interleaved, channel-major
        # bound_ref : (Bt, Pt, 2*C)      f32  [lo, hi] interleaved
        # anchor[p] = p*patch_stride + 0.5*(PS-1), p = global patch index of row
        p0 = pl.program_id(1) * Pt
        local_p = lax.broadcasted_iota(jnp.int32, (1, Pt, 1), 1)
        anchor = ((p0 + local_p).astype(jnp.float32) * float(patch_stride)
                  + 0.5 * (PS - 1.0))                                   # (1,Pt,1)

        # Tiny per-step lane constants (regenerated from iotas; no div/mod).
        lane = lax.broadcasted_iota(jnp.int32, (1, 1, W), 2)            # (1,1,W)
        is_x = jnp.bitwise_and(lane, 1) == 0                            # x at even lanes
        blane = lax.broadcasted_iota(jnp.int32, (1, 1, 2 * G), 2)       # (1,1,2G)
        is_lo = jnp.bitwise_and(blane, 1) == 0

        half_inv_ps1 = 0.5 * inv_ps1   # (2k) * half_inv_ps1 == k * inv_ps1 exactly

        for c0 in range(0, C, G):
            gcur = min(G, C - c0)
            blk = None   # (Bt,Pt,W)  points lanes for channels [c0, c0+gcur)
            bnd = None   # (Bt,Pt,2G) bound lanes for channels [c0, c0+gcur)
            for g in range(gcur):
                c = c0 + g
                dx = rel_ref[:, :, 2 * c: 2 * c + 1]                    # (Bt,Pt,1)
                ds = jnp.maximum(rel_ref[:, :, 2 * c + 1: 2 * c + 2] + s_bias, 0.0)
                ctr = dx + anchor
                lo = jnp.clip((ctr - ds) * inv_seq, 0.0, 1.0)           # (Bt,Pt,1)
                hi = jnp.clip((ctr + ds) * inv_seq, 0.0, 1.0)

                # x samples for this channel on its 2*PS lanes of the group;
                # garbage on other groups' lanes is masked by the where-chain.
                t = (lane - g * two_ps).astype(jnp.float32) * half_inv_ps1
                xv = lo + (hi - lo) * t                                 # (Bt,Pt,W)
                val = jnp.where(is_x, xv, float(c) * inv_c1)
                if blk is None:
                    blk = val
                else:
                    in_g = jnp.logical_and(lane >= g * two_ps,
                                           lane < (g + 1) * two_ps)
                    blk = jnp.where(in_g, val, blk)

                pair = jnp.where(is_lo, lo, hi)                         # (Bt,Pt,2G)
                if bnd is None:
                    bnd = pair
                else:
                    in_b = jnp.logical_and(blane >= 2 * g, blane < 2 * g + 2)
                    bnd = jnp.where(in_b, pair, bnd)

            # Group-wide stores: >=128 lanes per points store, one bound store
            # per group (instead of per-channel masked single-lane stores).
            pts_ref[:, :, c0 * two_ps:(c0 + gcur) * two_ps] = \
                blk[:, :, :gcur * two_ps]
            bound_ref[:, :, 2 * c0: 2 * (c0 + gcur)] = bnd[:, :, :2 * gcur]

    return boxcoder_kernel


def _pick_tiles(B, P, two_c, L, budget_bytes, split_for_megacore):
    """Choose (Bt, Pt) so the padded, double-buffered per-step VMEM fits budget.

    Padded bytes: last dim -> multiple of 128 lanes, second-to-last -> multiple
    of 8 sublanes, x2 for in/out double buffering."""

    def step_bytes(bt, pt):
        rows = bt * _round_up(pt, 8)
        per = rows * (2 * _round_up(two_c, 128) + _round_up(L, 128)) * 4
        return 2 * per

    p_cands = [d for d in range(1, P + 1) if P % d == 0 and (d == P or d % 8 == 0)]
    b_cands = [d for d in range(1, B + 1) if B % d == 0]
    best = None
    for bt in b_cands:
        for pt in p_cands:
            if step_bytes(bt, pt) <= budget_bytes:
                key = (bt * pt, pt, bt)
                if best is None or key > best[0]:
                    best = (key, bt, pt)
    if best is None:
        bt, pt = 1, min(p_cands)          # fallback; vmem limit raised by caller
    else:
        _, bt, pt = best

    # v7x megacore: only force >=2 "parallel" steps when there is enough work
    # to amortize the per-step cost; single-TC v5e/v6e prefer one big step.
    if split_for_megacore and (B // bt) * (P // pt) == 1:
        if bt % 2 == 0:
            bt //= 2
        else:
            smaller = [d for d in p_cands if d < pt]
            if smaller:
                pt = max(smaller)
    return bt, pt, step_bytes(bt, pt)


@functools.partial(jax.jit, static_argnames=("patch_count", "patch_stride",
                                              "patch_size", "seq_len", "channels"))
def boxcoder_forward(rel_codes, *, patch_count, patch_stride, patch_size,
                     seq_len, channels):
    B, P, C, two = rel_codes.shape
    assert two == 2 and P == patch_count and C == channels
    assert channels >= 2 and patch_size >= 2 and seq_len >= 2
    PS = patch_size
    two_c = 2 * C
    L = C * 2 * PS

    rel3 = rel_codes.astype(jnp.float32).reshape(B, P, two_c)   # free reshape

    s_bias = (patch_size - 1) / 2.0
    inv_seq = 1.0 / (seq_len - 1.0)
    inv_ps1 = 1.0 / (PS - 1.0)
    inv_c1 = 1.0 / (C - 1.0)

    # --- VMEM-budgeted tiling (gen-aware when get_tpu_info is available) ---
    try:
        vmem_cap = int(pltpu.get_tpu_info().vmem_capacity_bytes)
    except Exception:
        vmem_cap = 64 * 1024 * 1024        # v7x-sized conservative default
    budget = min(16 * 1024 * 1024, vmem_cap // 4)
    out_bytes = B * P * (L + two_c) * 4
    bt, pt, step_bytes = _pick_tiles(B, P, two_c, L, budget,
                                     split_for_megacore=out_bytes > (2 << 20))
    vmem_limit = min(max(32 * 1024 * 1024, step_bytes + (4 << 20)),
                     max(vmem_cap - (8 << 20), 32 * 1024 * 1024))

    # Channels processed per inner block so stores span >=128 lanes.
    G = min(C, -(-128 // (2 * PS)))

    kernel = _make_kernel(C, PS, pt, patch_stride, s_bias, inv_seq,
                          inv_ps1, inv_c1, G)

    grid = (B // bt, P // pt)
    pts_flat, bound_flat = pl.pallas_call(
        kernel,
        grid=grid,
        in_specs=[pl.BlockSpec((bt, pt, two_c), lambda i, j: (i, j, 0))],
        out_specs=(
            pl.BlockSpec((bt, pt, L), lambda i, j: (i, j, 0)),
            pl.BlockSpec((bt, pt, two_c), lambda i, j: (i, j, 0)),
        ),
        out_shape=(
            jax.ShapeDtypeStruct((B, P, L), jnp.float32),
            jax.ShapeDtypeStruct((B, P, two_c), jnp.float32),
        ),
        compiler_params=pltpu.CompilerParams(
            dimension_semantics=("parallel", "parallel"),
            vmem_limit_bytes=vmem_limit),
    )(rel3)

    # Pure row-major dim splits (bitcasts, no data movement).
    points = pts_flat.reshape(B, P, C, PS, 1, 2)
    bound = bound_flat.reshape(B, P, C, 2)
    return points, bound


def boxcoder_reference(rel_codes, *, patch_count, patch_stride, patch_size,
                       seq_len, channels):
    """Pure-JAX reference matching the PyTorch forward."""
    rel_codes = rel_codes.astype(jnp.float32)
    B, P, C, _ = rel_codes.shape
    anchor = jnp.arange(P, dtype=jnp.float32) * patch_stride + 0.5 * (patch_size - 1)
    s_bias = (patch_size - 1) / 2.0
    dx = rel_codes[..., 0]
    ds = jax.nn.relu(rel_codes[..., 1] + s_bias)
    ref_x = anchor.reshape(1, P, 1)
    bound = jnp.stack([dx + ref_x - ds, dx + ref_x + ds], axis=-1) / (seq_len - 1)
    bound = jnp.clip(bound, 0.0, 1.0)
    t = jnp.arange(patch_size, dtype=jnp.float32) / (patch_size - 1)
    xs = bound[..., 0:1] * (1.0 - t) + bound[..., 1:2] * t        # (B, P, C, PS)
    ys = jnp.broadcast_to(
        (jnp.arange(C, dtype=jnp.float32) / (channels - 1))[None, None, :, None],
        (B, P, C, patch_size))
    points = jnp.stack([xs[..., None], ys[..., None]], axis=-1)
    return points, bound


if __name__ == "__main__":
    # small deterministic configuration
    B = 2
    patch_count = 8
    patch_stride = 8
    patch_size = 16
    channels = 4
    seq_len = (patch_count - 1) * patch_stride + patch_size       # 72

    key = jax.random.PRNGKey(0)
    rel_codes = jax.random.normal(
        key, (B, patch_count, channels, 2), dtype=jnp.float32) * 3.0

    points, bound = boxcoder_forward(
        rel_codes, patch_count=patch_count, patch_stride=patch_stride,
        patch_size=patch_size, seq_len=seq_len, channels=channels)
    jax.block_until_ready((points, bound))

    # sanity check against pure-JAX reference
    ref_points, ref_bound = boxcoder_reference(
        rel_codes, patch_count=patch_count, patch_stride=patch_stride,
        patch_size=patch_size, seq_len=seq_len, channels=channels)
    assert points.shape == (B, patch_count, channels, patch_size, 1, 2)
    assert bound.shape == (B, patch_count, channels, 2)
    assert jnp.allclose(points, ref_points, atol=2e-6)
    assert jnp.allclose(bound, ref_bound, atol=2e-6)

    print("KERNEL_OK")
</pallas_src>

<mosaic_0001>
module attributes {stable_mosaic.version = 11 : i64} {
  func.func @boxcoder_kernel(%arg0: i32, %arg1: i32, %arg2: memref<2x8x8xf32, #tpu.memory_space<vmem>>, %arg3: memref<2x8x128xf32, #tpu.memory_space<vmem>>, %arg4: memref<2x8x8xf32, #tpu.memory_space<vmem>>) attributes {dimension_semantics = [#tpu.dimension_semantics<parallel>, #tpu.dimension_semantics<parallel>], iteration_bounds = array<i64: 1, 1>, scalar_prefetch = 0 : i64, scratch_operands = 0 : i64, tpu.core_type = #tpu.core_type<tc>, window_params = [{transform_indices = @transform_0, window_bounds = array<i64: 2, 8, 8>}, {transform_indices = @transform_1, window_bounds = array<i64: 2, 8, 128>}, {transform_indices = @transform_2, window_bounds = array<i64: 2, 8, 8>}]} {
    %c8_i32 = arith.constant 8 : i32
    %0 = arith.muli %arg1, %c8_i32 : i32
    %1 = tpu.iota {dimensions = array<i32: 1>} : vector<1x8x1xi32>
    %2 = vector.broadcast %0 : i32 to vector<1x8x1xi32>
    %3 = arith.addi %2, %1 : vector<1x8x1xi32>
    %4 = arith.sitofp %3 : vector<1x8x1xi32> to vector<1x8x1xf32>
    %cst = arith.constant 8.000000e+00 : f32
    %5 = vector.broadcast %cst : f32 to vector<1x8x1xf32>
    %6 = arith.mulf %4, %5 : vector<1x8x1xf32>
    %cst_0 = arith.constant 7.500000e+00 : f32
    %7 = vector.broadcast %cst_0 : f32 to vector<1x8x1xf32>
    %8 = arith.addf %6, %7 : vector<1x8x1xf32>
    %9 = tpu.iota {dimensions = array<i32: 2>} : vector<1x1x128xi32>
    %c1_i32 = arith.constant 1 : i32
    %10 = vector.broadcast %c1_i32 : i32 to vector<1x1x128xi32>
    %11 = arith.andi %9, %10 : vector<1x1x128xi32>
    %c0_i32 = arith.constant 0 : i32
    %12 = vector.broadcast %c0_i32 : i32 to vector<1x1x128xi32>
    %13 = arith.cmpi eq, %11, %12 : vector<1x1x128xi32>
    %14 = tpu.iota {dimensions = array<i32: 2>} : vector<1x1x8xi32>
    %c1_i32_1 = arith.constant 1 : i32
    %15 = vector.broadcast %c1_i32_1 : i32 to vector<1x1x8xi32>
    %16 = arith.andi %14, %15 : vector<1x1x8xi32>
    %c0_i32_2 = arith.constant 0 : i32
    %17 = vector.broadcast %c0_i32_2 : i32 to vector<1x1x8xi32>
    %18 = arith.cmpi eq, %16, %17 : vector<1x1x8xi32>
    %c0 = arith.constant 0 : index
    %c0_3 = arith.constant 0 : index
    %c0_4 = arith.constant 0 : index
    %19 = vector.load %arg2[%c0, %c0_3, %c0_4] : memref<2x8x8xf32, #tpu.memory_space<vmem>>, vector<2x8x1xf32>
    %c0_5 = arith.constant 0 : index
    %c0_6 = arith.constant 0 : index
    %c1 = arith.constant 1 : index
    %20 = vector.load %arg2[%c0_5, %c0_6, %c1] : memref<2x8x8xf32, #tpu.memory_space<vmem>>, vector<2x8x1xf32>
    %cst_7 = arith.constant 7.500000e+00 : f32
    %21 = vector.broadcast %cst_7 : f32 to vector<2x8x1xf32>
    %22 = arith.addf %20, %21 : vector<2x8x1xf32>
    %cst_8 = arith.constant 0.000000e+00 : f32
    %23 = vector.broadcast %cst_8 : f32 to vector<2x8x1xf32>
    %24 = arith.maximumf %22, %23 : vector<2x8x1xf32>
    %25 = vector.broadcast %8 : vector<1x8x1xf32> to vector<2x8x1xf32>
    %26 = arith.addf %19, %25 : vector<2x8x1xf32>
    %27 = arith.subf %26, %24 : vector<2x8x1xf32>
    %cst_9 = arith.constant 0.0140845068 : f32
    %28 = vector.broadcast %cst_9 : f32 to vector<2x8x1xf32>
    %29 = arith.mulf %27, %28 : vector<2x8x1xf32>
    %cst_10 = arith.constant 0.000000e+00 : f32
    %cst_11 = arith.constant 1.000000e+00 : f32
    %30 = vector.broadcast %cst_10 : f32 to vector<2x8x1xf32>
    %31 = arith.maximumf %30, %29 : vector<2x8x1xf32>
    %32 = vector.broadcast %cst_11 : f32 to vector<2x8x1xf32>
    %33 = arith.minimumf %32, %31 : vector<2x8x1xf32>
    %34 = arith.addf %26, %24 : vector<2x8x1xf32>
    %cst_12 = arith.constant 0.0140845068 : f32
    %35 = vector.broadcast %cst_12 : f32 to vector<2x8x1xf32>
    %36 = arith.mulf %34, %35 : vector<2x8x1xf32>
    %cst_13 = arith.constant 0.000000e+00 : f32
    %cst_14 = arith.constant 1.000000e+00 : f32
    %37 = vector.broadcast %cst_13 : f32 to vector<2x8x1xf32>
    %38 = arith.maximumf %37, %36 : vector<2x8x1xf32>
    %39 = vector.broadcast %cst_14 : f32 to vector<2x8x1xf32>
    %40 = arith.minimumf %39, %38 : vector<2x8x1xf32>
    %c0_i32_15 = arith.constant 0 : i32
    %41 = vector.broadcast %c0_i32_15 : i32 to vector<1x1x128xi32>
    %42 = arith.subi %9, %41 : vector<1x1x128xi32>
    %43 = arith.sitofp %42 : vector<1x1x128xi32> to vector<1x1x128xf32>
    %cst_16 = arith.constant 0.0333333351 : f32
    %44 = vector.broadcast %cst_16 : f32 to vector<1x1x128xf32>
    %45 = arith.mulf %43, %44 : vector<1x1x128xf32>
    %46 = arith.subf %40, %33 : vector<2x8x1xf32>
    %47 = vector.broadcast %46 : vector<2x8x1xf32> to vector<2x8x128xf32>
    %48 = vector.broadcast %45 : vector<1x1x128xf32> to vector<2x8x128xf32>
    %49 = arith.mulf %47, %48 : vector<2x8x128xf32>
    %50 = vector.broadcast %33 : vector<2x8x1xf32> to vector<2x8x128xf32>
    %51 = arith.addf %50, %49 : vector<2x8x128xf32>
    %cst_17 = arith.constant 0.000000e+00 : f32
    %52 = vector.shape_cast %13 : vector<1x1x128xi1> to vector<1x1x128xi1>
    %53 = vector.broadcast %52 : vector<1x1x128xi1> to vector<2x8x128xi1>
    %54 = vector.broadcast %cst_17 : f32 to vector<2x8x128xf32>
    %55 = arith.select %53, %51, %54 : vector<2x8x128xi1>, vector<2x8x128xf32>
    %56 = vector.shape_cast %18 : vector<1x1x8xi1> to vector<1x1x8xi1>
    %57 = vector.broadcast %56 : vector<1x1x8xi1> to vector<2x8x8xi1>
    %58 = vector.shape_cast %33 : vector<2x8x1xf32> to vector<2x8x1xf32>
    %59 = vector.broadcast %58 : vector<2x8x1xf32> to vector<2x8x8xf32>
    %60 = vector.shape_cast %40 : vector<2x8x1xf32> to vector<2x8x1xf32>
    %61 = vector.broadcast %60 : vector<2x8x1xf32> to vector<2x8x8xf32>
    %62 = arith.select %57, %59, %61 : vector<2x8x8xi1>, vector<2x8x8xf32>
    %c0_18 = arith.constant 0 : index
    %c0_19 = arith.constant 0 : index
    %c2 = arith.constant 2 : index
    %63 = vector.load %arg2[%c0_18, %c0_19, %c2] : memref<2x8x8xf32, #tpu.memory_space<vmem>>, vector<2x8x1xf32>
    %c0_20 = arith.constant 0 : index
    %c0_21 = arith.constant 0 : index
    %c3 = arith.constant 3 : index
    %64 = vector.load %arg2[%c0_20, %c0_21, %c3] : memref<2x8x8xf32, #tpu.memory_space<vmem>>, vector<2x8x1xf32>
    %cst_22 = arith.constant 7.500000e+00 : f32
    %65 = vector.broadcast %cst_22 : f32 to vector<2x8x1xf32>
    %66 = arith.addf %64, %65 : vector<2x8x1xf32>
    %cst_23 = arith.constant 0.000000e+00 : f32
    %67 = vector.broadcast %cst_23 : f32 to vector<2x8x1xf32>
    %68 = arith.maximumf %66, %67 : vector<2x8x1xf32>
    %69 = vector.broadcast %8 : vector<1x8x1xf32> to vector<2x8x1xf32>
    %70 = arith.addf %63, %69 : vector<2x8x1xf32>
    %71 = arith.subf %70, %68 : vector<2x8x1xf32>
    %cst_24 = arith.constant 0.0140845068 : f32
    %72 = vector.broadcast %cst_24 : f32 to vector<2x8x1xf32>
    %73 = arith.mulf %71, %72 : vector<2x8x1xf32>
    %cst_25 = arith.constant 0.000000e+00 : f32
    %cst_26 = arith.constant 1.000000e+00 : f32
    %74 = vector.broadcast %cst_25 : f32 to vector<2x8x1xf32>
    %75 = arith.maximumf %74, %73 : vector<2x8x1xf32>
    %76 = vector.broadcast %cst_26 : f32 to vector<2x8x1xf32>
    %77 = arith.minimumf %76, %75 : vector<2x8x1xf32>
    %78 = arith.addf %70, %68 : vector<2x8x1xf32>
    %cst_27 = arith.constant 0.0140845068 : f32
    %79 = vector.broadcast %cst_27 : f32 to vector<2x8x1xf32>
    %80 = arith.mulf %78, %79 : vector<2x8x1xf32>
    %cst_28 = arith.constant 0.000000e+00 : f32
    %cst_29 = arith.constant 1.000000e+00 : f32
    %81 = vector.broadcast %cst_28 : f32 to vector<2x8x1xf32>
    %82 = arith.maximumf %81, %80 : vector<2x8x1xf32>
    %83 = vector.broadcast %cst_29 : f32 to vector<2x8x1xf32>
    %84 = arith.minimumf %83, %82 : vector<2x8x1xf32>
    %c32_i32 = arith.constant 32 : i32
    %85 = vector.broadcast %c32_i32 : i32 to vector<1x1x128xi32>
    %86 = arith.subi %9, %85 : vector<1x1x128xi32>
    %87 = arith.sitofp %86 : vector<1x1x128xi32> to vector<1x1x128xf32>
    %cst_30 = arith.constant 0.0333333351 : f32
    %88 = vector.broadcast %cst_30 : f32 to vector<1x1x128xf32>
    %89 = arith.mulf %87, %88 : vector<1x1x128xf32>
    %90 = arith.subf %84, %77 : vector<2x8x1xf32>
    %91 = vector.broadcast %90 : vector<2x8x1xf32> to vector<2x8x128xf32>
    %92 = vector.broadcast %89 : vector<1x1x128xf32> to vector<2x8x128xf32>
    %93 = arith.mulf %91, %92 : vector<2x8x128xf32>
    %94 = vector.broadcast %77 : vector<2x8x1xf32> to vector<2x8x128xf32>
    %95 = arith.addf %94, %93 : vector<2x8x128xf32>
    %cst_31 = arith.constant 0.333333343 : f32
    %96 = vector.shape_cast %13 : vector<1x1x128xi1> to vector<1x1x128xi1>
    %97 = vector.broadcast %96 : vector<1x1x128xi1> to vector<2x8x128xi1>
    %98 = vector.broadcast %cst_31 : f32 to vector<2x8x128xf32>
    %99 = arith.select %97, %95, %98 : vector<2x8x128xi1>, vector<2x8x128xf32>
    %c32_i32_32 = arith.constant 32 : i32
    %100 = vector.broadcast %c32_i32_32 : i32 to vector<1x1x128xi32>
    %101 = arith.cmpi sge, %9, %100 : vector<1x1x128xi32>
    %c64_i32 = arith.constant 64 : i32
    %102 = vector.broadcast %c64_i32 : i32 to vector<1x1x128xi32>
    %103 = arith.cmpi slt, %9, %102 : vector<1x1x128xi32>
    %104 = arith.andi %101, %103 : vector<1x1x128xi1>
    %105 = vector.shape_cast %104 : vector<1x1x128xi1> to vector<1x1x128xi1>
    %106 = vector.broadcast %105 : vector<1x1x128xi1> to vector<2x8x128xi1>
    %107 = arith.select %106, %99, %55 : vector<2x8x128xi1>, vector<2x8x128xf32>
    %108 = vector.shape_cast %18 : vector<1x1x8xi1> to vector<1x1x8xi1>
    %109 = vector.broadcast %108 : vector<1x1x8xi1> to vector<2x8x8xi1>
    %110 = vector.shape_cast %77 : vector<2x8x1xf32> to vector<2x8x1xf32>
    %111 = vector.broadcast %110 : vector<2x8x1xf32> to vector<2x8x8xf32>
    %112 = vector.shape_cast %84 : vector<2x8x1xf32> to vector<2x8x1xf32>
    %113 = vector.broadcast %112 : vector<2x8x1xf32> to vector<2x8x8xf32>
    %114 = arith.select %109, %111, %113 : vector<2x8x8xi1>, vector<2x8x8xf32>
    %c2_i32 = arith.constant 2 : i32
    %115 = vector.broadcast %c2_i32 : i32 to vector<1x1x8xi32>
    %116 = arith.cmpi sge, %14, %115 : vector<1x1x8xi32>
    %c4_i32 = arith.constant 4 : i32
    %117 = vector.broadcast %c4_i32 : i32 to vector<1x1x8xi32>
    %118 = arith.cmpi slt, %14, %117 : vector<1x1x8xi32>
    %119 = arith.andi %116, %118 : vector<1x1x8xi1>
    %120 = vector.shape_cast %119 : vector<1x1x8xi1> to vector<1x1x8xi1>
    %121 = vector.broadcast %120 : vector<1x1x8xi1> to vector<2x8x8xi1>
    %122 = arith.select %121, %114, %62 : vector<2x8x8xi1>, vector<2x8x8xf32>
    %c0_33 = arith.constant 0 : index
    %c0_34 = arith.constant 0 : index
    %c4 = arith.constant 4 : index
    %123 = vector.load %arg2[%c0_33, %c0_34, %c4] : memref<2x8x8xf32, #tpu.memory_space<vmem>>, vector<2x8x1xf32>
    %c0_35 = arith.constant 0 : index
    %c0_36 = arith.constant 0 : index
    %c5 = arith.constant 5 : index
    %124 = vector.load %arg2[%c0_35, %c0_36, %c5] : memref<2x8x8xf32, #tpu.memory_space<vmem>>, vector<2x8x1xf32>
    %cst_37 = arith.constant 7.500000e+00 : f32
    %125 = vector.broadcast %cst_37 : f32 to vector<2x8x1xf32>
    %126 = arith.addf %124, %125 : vector<2x8x1xf32>
    %cst_38 = arith.constant 0.000000e+00 : f32
    %127 = vector.broadcast %cst_38 : f32 to vector<2x8x1xf32>
    %128 = arith.maximumf %126, %127 : vector<2x8x1xf32>
    %129 = vector.broadcast %8 : vector<1x8x1xf32> to vector<2x8x1xf32>
    %130 = arith.addf %123, %129 : vector<2x8x1xf32>
    %131 = arith.subf %130, %128 : vector<2x8x1xf32>
    %cst_39 = arith.constant 0.0140845068 : f32
    %132 = vector.broadcast %cst_39 : f32 to vector<2x8x1xf32>
    %133 = arith.mulf %131, %132 : vector<2x8x1xf32>
    %cst_40 = arith.constant 0.000000e+00 : f32
    %cst_41 = arith.constant 1.000000e+00 : f32
    %134 = vector.broadcast %cst_40 : f32 to vector<2x8x1xf32>
    %135 = arith.maximumf %134, %133 : vector<2x8x1xf32>
    %136 = vector.broadcast %cst_41 : f32 to vector<2x8x1xf32>
    %137 = arith.minimumf %136, %135 : vector<2x8x1xf32>
    %138 = arith.addf %130, %128 : vector<2x8x1xf32>
    %cst_42 = arith.constant 0.0140845068 : f32
    %139 = vector.broadcast %cst_42 : f32 to vector<2x8x1xf32>
    %140 = arith.mulf %138, %139 : vector<2x8x1xf32>
    %cst_43 = arith.constant 0.000000e+00 : f32
    %cst_44 = arith.constant 1.000000e+00 : f32
    %141 = vector.broadcast %cst_43 : f32 to vector<2x8x1xf32>
    %142 = arith.maximumf %141, %140 : vector<2x8x1xf32>
    %143 = vector.broadcast %cst_44 : f32 to vector<2x8x1xf32>
    %144 = arith.minimumf %143, %142 : vector<2x8x1xf32>
    %c64_i32_45 = arith.constant 64 : i32
    %145 = vector.broadcast %c64_i32_45 : i32 to vector<1x1x128xi32>
    %146 = arith.subi %9, %145 : vector<1x1x128xi32>
    %147 = arith.sitofp %146 : vector<1x1x128xi32> to vector<1x1x128xf32>
    %cst_46 = arith.constant 0.0333333351 : f32
    %148 = vector.broadcast %cst_46 : f32 to vector<1x1x128xf32>
    %149 = arith.mulf %147, %148 : vector<1x1x128xf32>
    %150 = arith.subf %144, %137 : vector<2x8x1xf32>
    %151 = vector.broadcast %150 : vector<2x8x1xf32> to vector<2x8x128xf32>
    %152 = vector.broadcast %149 : vector<1x1x128xf32> to vector<2x8x128xf32>
    %153 = arith.mulf %151, %152 : vector<2x8x128xf32>
    %154 = vector.broadcast %137 : vector<2x8x1xf32> to vector<2x8x128xf32>
    %155 = arith.addf %154, %153 : vector<2x8x128xf32>
    %cst_47 = arith.constant 0.666666686 : f32
    %156 = vector.shape_cast %13 : vector<1x1x128xi1> to vector<1x1x128xi1>
    %157 = vector.broadcast %156 : vector<1x1x128xi1> to vector<2x8x128xi1>
    %158 = vector.broadcast %cst_47 : f32 to vector<2x8x128xf32>
    %159 = arith.select %157, %155, %158 : vector<2x8x128xi1>, vector<2x8x128xf32>
    %c64_i32_48 = arith.constant 64 : i32
    %160 = vector.broadcast %c64_i32_48 : i32 to vector<1x1x128xi32>
    %161 = arith.cmpi sge, %9, %160 : vector<1x1x128xi32>
    %c96_i32 = arith.constant 96 : i32
    %162 = vector.broadcast %c96_i32 : i32 to vector<1x1x128xi32>
    %163 = arith.cmpi slt, %9, %162 : vector<1x1x128xi32>
    %164 = arith.andi %161, %163 : vector<1x1x128xi1>
    %165 = vector.shape_cast %164 : vector<1x1x128xi1> to vector<1x1x128xi1>
    %166 = vector.broadcast %165 : vector<1x1x128xi1> to vector<2x8x128xi1>
    %167 = arith.select %166, %159, %107 : vector<2x8x128xi1>, vector<2x8x128xf32>
    %168 = vector.shape_cast %18 : vector<1x1x8xi1> to vector<1x1x8xi1>
    %169 = vector.broadcast %168 : vector<1x1x8xi1> to vector<2x8x8xi1>
    %170 = vector.shape_cast %137 : vector<2x8x1xf32> to vector<2x8x1xf32>
    %171 = vector.broadcast %170 : vector<2x8x1xf32> to vector<2x8x8xf32>
    %172 = vector.shape_cast %144 : vector<2x8x1xf32> to vector<2x8x1xf32>
    %173 = vector.broadcast %172 : vector<2x8x1xf32> to vector<2x8x8xf32>
    %174 = arith.select %169, %171, %173 : vector<2x8x8xi1>, vector<2x8x8xf32>
    %c4_i32_49 = arith.constant 4 : i32
    %175 = vector.broadcast %c4_i32_49 : i32 to vector<1x1x8xi32>
    %176 = arith.cmpi sge, %14, %175 : vector<1x1x8xi32>
    %c6_i32 = arith.constant 6 : i32
    %177 = vector.broadcast %c6_i32 : i32 to vector<1x1x8xi32>
    %178 = arith.cmpi slt, %14, %177 : vector<1x1x8xi32>
    %179 = arith.andi %176, %178 : vector<1x1x8xi1>
    %180 = vector.shape_cast %179 : vector<1x1x8xi1> to vector<1x1x8xi1>
    %181 = vector.broadcast %180 : vector<1x1x8xi1> to vector<2x8x8xi1>
    %182 = arith.select %181, %174, %122 : vector<2x8x8xi1>, vector<2x8x8xf32>
    %c0_50 = arith.constant 0 : index
    %c0_51 = arith.constant 0 : index
    %c6 = arith.constant 6 : index
    %183 = vector.load %arg2[%c0_50, %c0_51, %c6] : memref<2x8x8xf32, #tpu.memory_space<vmem>>, vector<2x8x1xf32>
    %c0_52 = arith.constant 0 : index
    %c0_53 = arith.constant 0 : index
    %c7 = arith.constant 7 : index
    %184 = vector.load %arg2[%c0_52, %c0_53, %c7] : memref<2x8x8xf32, #tpu.memory_space<vmem>>, vector<2x8x1xf32>
    %cst_54 = arith.constant 7.500000e+00 : f32
    %185 = vector.broadcast %cst_54 : f32 to vector<2x8x1xf32>
    %186 = arith.addf %184, %185 : vector<2x8x1xf32>
    %cst_55 = arith.constant 0.000000e+00 : f32
    %187 = vector.broadcast %cst_55 : f32 to vector<2x8x1xf32>
    %188 = arith.maximumf %186, %187 : vector<2x8x1xf32>
    %189 = vector.broadcast %8 : vector<1x8x1xf32> to vector<2x8x1xf32>
    %190 = arith.addf %183, %189 : vector<2x8x1xf32>
    %191 = arith.subf %190, %188 : vector<2x8x1xf32>
    %cst_56 = arith.constant 0.0140845068 : f32
    %192 = vector.broadcast %cst_56 : f32 to vector<2x8x1xf32>
    %193 = arith.mulf %191, %192 : vector<2x8x1xf32>
    %cst_57 = arith.constant 0.000000e+00 : f32
    %cst_58 = arith.constant 1.000000e+00 : f32
    %194 = vector.broadcast %cst_57 : f32 to vector<2x8x1xf32>
    %195 = arith.maximumf %194, %193 : vector<2x8x1xf32>
    %196 = vector.broadcast %cst_58 : f32 to vector<2x8x1xf32>
    %197 = arith.minimumf %196, %195 : vector<2x8x1xf32>
    %198 = arith.addf %190, %188 : vector<2x8x1xf32>
    %cst_59 = arith.constant 0.0140845068 : f32
    %199 = vector.broadcast %cst_59 : f32 to vector<2x8x1xf32>
    %200 = arith.mulf %198, %199 : vector<2x8x1xf32>
    %cst_60 = arith.constant 0.000000e+00 : f32
    %cst_61 = arith.constant 1.000000e+00 : f32
    %201 = vector.broadcast %cst_60 : f32 to vector<2x8x1xf32>
    %202 = arith.maximumf %201, %200 : vector<2x8x1xf32>
    %203 = vector.broadcast %cst_61 : f32 to vector<2x8x1xf32>
    %204 = arith.minimumf %203, %202 : vector<2x8x1xf32>
    %c96_i32_62 = arith.constant 96 : i32
    %205 = vector.broadcast %c96_i32_62 : i32 to vector<1x1x128xi32>
    %206 = arith.subi %9, %205 : vector<1x1x128xi32>
    %207 = arith.sitofp %206 : vector<1x1x128xi32> to vector<1x1x128xf32>
    %cst_63 = arith.constant 0.0333333351 : f32
    %208 = vector.broadcast %cst_63 : f32 to vector<1x1x128xf32>
    %209 = arith.mulf %207, %208 : vector<1x1x128xf32>
    %210 = arith.subf %204, %197 : vector<2x8x1xf32>
    %211 = vector.broadcast %210 : vector<2x8x1xf32> to vector<2x8x128xf32>
    %212 = vector.broadcast %209 : vector<1x1x128xf32> to vector<2x8x128xf32>
    %213 = arith.mulf %211, %212 : vector<2x8x128xf32>
    %214 = vector.broadcast %197 : vector<2x8x1xf32> to vector<2x8x128xf32>
    %215 = arith.addf %214, %213 : vector<2x8x128xf32>
    %cst_64 = arith.constant 1.000000e+00 : f32
    %216 = vector.shape_cast %13 : vector<1x1x128xi1> to vector<1x1x128xi1>
    %217 = vector.broadcast %216 : vector<1x1x128xi1> to vector<2x8x128xi1>
    %218 = vector.broadcast %cst_64 : f32 to vector<2x8x128xf32>
    %219 = arith.select %217, %215, %218 : vector<2x8x128xi1>, vector<2x8x128xf32>
    %c96_i32_65 = arith.constant 96 : i32
    %220 = vector.broadcast %c96_i32_65 : i32 to vector<1x1x128xi32>
    %221 = arith.cmpi sge, %9, %220 : vector<1x1x128xi32>
    %c128_i32 = arith.constant 128 : i32
    %222 = vector.broadcast %c128_i32 : i32 to vector<1x1x128xi32>
    %223 = arith.cmpi slt, %9, %222 : vector<1x1x128xi32>
    %224 = arith.andi %221, %223 : vector<1x1x128xi1>
    %225 = vector.shape_cast %224 : vector<1x1x128xi1> to vector<1x1x128xi1>
    %226 = vector.broadcast %225 : vector<1x1x128xi1> to vector<2x8x128xi1>
    %227 = arith.select %226, %219, %167 : vector<2x8x128xi1>, vector<2x8x128xf32>
    %228 = vector.shape_cast %18 : vector<1x1x8xi1> to vector<1x1x8xi1>
    %229 = vector.broadcast %228 : vector<1x1x8xi1> to vector<2x8x8xi1>
    %230 = vector.shape_cast %197 : vector<2x8x1xf32> to vector<2x8x1xf32>
    %231 = vector.broadcast %230 : vector<2x8x1xf32> to vector<2x8x8xf32>
    %232 = vector.shape_cast %204 : vector<2x8x1xf32> to vector<2x8x1xf32>
    %233 = vector.broadcast %232 : vector<2x8x1xf32> to vector<2x8x8xf32>
    %234 = arith.select %229, %231, %233 : vector<2x8x8xi1>, vector<2x8x8xf32>
    %c6_i32_66 = arith.constant 6 : i32
    %235 = vector.broadcast %c6_i32_66 : i32 to vector<1x1x8xi32>
    %236 = arith.cmpi sge, %14, %235 : vector<1x1x8xi32>
    %c8_i32_67 = arith.constant 8 : i32
    %237 = vector.broadcast %c8_i32_67 : i32 to vector<1x1x8xi32>
    %238 = arith.cmpi slt, %14, %237 : vector<1x1x8xi32>
    %239 = arith.andi %236, %238 : vector<1x1x8xi1>
    %240 = vector.shape_cast %239 : vector<1x1x8xi1> to vector<1x1x8xi1>
    %241 = vector.broadcast %240 : vector<1x1x8xi1> to vector<2x8x8xi1>
    %242 = arith.select %241, %234, %182 : vector<2x8x8xi1>, vector<2x8x8xf32>
    %c0_68 = arith.constant 0 : index
    %c0_69 = arith.constant 0 : index
    %c0_70 = arith.constant 0 : index
    %243 = vector.load %arg3[%c0_68, %c0_69, %c0_70] : memref<2x8x128xf32, #tpu.memory_space<vmem>>, vector<2x8x128xf32>
    tpu.vector_store %arg3[%c0_68, %c0_69, %c0_70], %227 {strides = array<i32>} : memref<2x8x128xf32, #tpu.memory_space<vmem>>, vector<2x8x128xf32>,
    %c0_71 = arith.constant 0 : index
    %c0_72 = arith.constant 0 : index
    %c0_73 = arith.constant 0 : index
    %244 = vector.load %arg4[%c0_71, %c0_72, %c0_73] : memref<2x8x8xf32, #tpu.memory_space<vmem>>, vector<2x8x8xf32>
    tpu.vector_store %arg4[%c0_71, %c0_72, %c0_73], %242 {strides = array<i32>} : memref<2x8x8xf32, #tpu.memory_space<vmem>>, vector<2x8x8xf32>,
    return
  }
  func.func @transform_0(%arg0: i32, %arg1: i32) -> (i32, i32, i32) {
    %c0_i32 = arith.constant 0 : i32
    %c0_i32_0 = arith.constant 0 : i32
    return %arg0, %arg1, %c0_i32 : i32, i32, i32
  }
  func.func @transform_1(%arg0: i32, %arg1: i32) -> (i32, i32, i32) {
    %c0_i32 = arith.constant 0 : i32
    %c0_i32_0 = arith.constant 0 : i32
    return %arg0, %arg1, %c0_i32 : i32, i32, i32
  }
  func.func @transform_2(%arg0: i32, %arg1: i32) -> (i32, i32, i32) {
    %c0_i32 = arith.constant 0 : i32
    %c0_i32_0 = arith.constant 0 : i32
    return %arg0, %arg1, %c0_i32 : i32, i32, i32
  }
}

</mosaic_0001>

<bundles_post_ra>
// kernel: boxcoder_forward.1
= control target key start
LH: loop header
LB: loop body
LE: loop exit
PB: predicated region body
PF: predicated region fallthrough
CT: control target
= control target key end

     0   :  { %s284_s13 = smov 127   ;;  %v285_v6 = vmov 0   ;;  %v11_v7 = vlaneseq  ;;  %v286_v32 = vmov 2   ;;  %v287_v33 = vmov 4   ;;  %s431_s0 = inlined_call_operand.vmem [shape: f32[2,8,8], index: 0, kind: input, shape index: {}]   ;;  %s432_s2 = inlined_call_operand.vmem [shape: f32[2,8,8], index: 2, kind: output, shape index: {1}]   ;;  %s433_s1 = inlined_call_operand.vmem [shape: f32[2,8,128], index: 1, kind: output, shape index: {0}]  }
   0x1   :  { %v22_v0 = vld [vmem:[%s431_s0] sm:$0xff]  ;;  %v23_v2 = vld [vmem:[%s431_s0 + $0x8] sm:$0xff]  ;;  %267 = vset.pattern.permute.xlu0 %v285_v6  ;;  %266 = vset.pattern.permute.xlu2 %v285_v6  ;;  %v288_v34 = vmov 6   ;;  %vm247_vm13 = vcmask 64512  }
   0x2   :  { %v24_v1 = vadd.f32 7.5, %v22_v0  ;;  %v25_v4 = vadd.f32 7.5, %v23_v2  ;;  %268 = vset.pattern.permute.xlu1 %v285_v6  ;;  %v12_v8 = vshrl.u32 %v11_v7, 7  ;;  %v314_v39 = vand.u32 127, %v11_v7 }
   0x4   :  { %v26_v3 = vmax.f32 %v24_v1, 0.0  ;;  %v27_v5 = vmax.f32 %v25_v4, 0.0  ;;  %v15_v9 = vcvt.s32.f32 %v12_v8  ;;  %v20_v41 = vand.u32 1, %v314_v39 }
   0x5   :  { %vm140_vm1 = vcmp.ge.s32.totalorder %v314_v39, 2  ;;  %vm141_vm2 = vcmp.lt.s32.totalorder %v314_v39, 4  ;;  %vm189_vm3 = vcmp.ge.s32.totalorder %v314_v39, 4  ;;  %vm190_vm4 = vcmp.lt.s32.totalorder %v314_v39, 6 }
   0x6   :  { %32 = vrot.lane.b32.xlu0 %v26_v3, %s284_s13  ;;  %v16_v10 = vmul.f32 8.0, %v15_v9  ;;  %vm317_vm0 = vcmp.eq.s32.totalorder %v20_v41, 0  ;;  %vm329_vm5 = vmand %vm140_vm1, %vm141_vm2  ;;  %v258_v51 = vadd.s32 4294967264, %v314_v39  ;;  %v54_v4 = vcvt.s32.f32 %v314_v39 }
   0x7   :  { %vm336_vm6 = vmand %vm189_vm3, %vm190_vm4  ;;  %vm123_vm7 = vcmp.ge.s32.totalorder %v314_v39, 32  ;;  %vm124_vm8 = vcmp.lt.s32.totalorder %v314_v39, 64  ;;  %v259_v9 = vadd.s32 4294967232, %v314_v39  ;;  %vm238_vm10 = vcmp.ge.s32.totalorder %v314_v39, 6 }
   0x8   :  { %v17_v11 = vadd.f32 7.5, %v16_v10  ;;  %v99_v59 = vcvt.s32.f32 %v258_v51  ;;  %vm357_vm9 = vmand %vm123_vm7, %vm124_vm8  ;;  %vm239_vm11 = vcmp.lt.s32.totalorder %v314_v39, 8  ;;  %vm172_vm14 = vcmp.ge.s32.totalorder %v314_v39, 64 }
   0x9   :  { %vm376_vm12 = vmand %vm238_vm10, %vm239_vm11  ;;  %vm173_vm15 = vcmp.lt.s32.totalorder %v314_v39, 96  ;;  %vm221_vm2 = vcmp.ge.s32.totalorder %v314_v39, 96 }
   0xa   :  { %v28_v12 = vadd.f32 %v22_v0, %v17_v11  ;;  %v29_v20 = vadd.f32 %v23_v2, %v17_v11  ;;  %v100_v60 = vmul.f32 0.033333335, %v99_v59  ;;  %vm174_vm1 = vmand %vm172_vm14, %vm173_vm15 }
   0xe   :  { %34 = vrot.lane.b32.xlu0 %v27_v5, %s284_s13  ;;  %v55_v5 = vmul.f32 0.033333335, %v54_v4 }
  0x78   :  { %v33_v13 = vpop.permute.xlu0 %32 }
  0x79   :  { %v38_v14 = vsub.f32 %v28_v12, %v33_v13  ;;  %v46_v15 = vadd.f32 %v33_v13, %v28_v12  ;;  %v260_v12 = vadd.s32 4294967200, %v314_v39 }
  0x7b   :  { %v40_v16 = vmul.f32 0.014084507, %v38_v14  ;;  %v48_v17 = vmul.f32 0.014084507, %v46_v15 }
  0x7d   :  { %v42_v18 = vmax.f32 %v40_v16, 0.0  ;;  %v50_v19 = vmax.f32 %v48_v17, 0.0  ;;  %v148_v17 = vcvt.s32.f32 %v259_v9 }
  0x7f   :  { %v44_v21 = vmin.f32 %v42_v18, 1.0  ;;  %v52_v22 = vmin.f32 %v50_v19, 1.0  ;;  %v197_v19 = vcvt.s32.f32 %v260_v12 }
  0x80   :  { %v35_v23 = vpop.permute.xlu0 %34 }
  0x81   :  { %v39_v24 = vsub.f32 %v29_v20, %v35_v23  ;;  %v47_v25 = vadd.f32 %v35_v23, %v29_v20  ;;  %88 = vperm.xlu0 %267, %v52_v22   ;;  %72 = vperm.xlu2 %266, %v44_v21   ;;  %v56_v35 = vsub.f32 %v52_v22, %v44_v21 }
  0x83   :  { %v41_v26 = vmul.f32 0.014084507, %v39_v24  ;;  %v49_v27 = vmul.f32 0.014084507, %v47_v25 }
  0x85   :  { %v43_v28 = vmax.f32 %v41_v26, 0.0  ;;  %v51_v29 = vmax.f32 %v49_v27, 0.0  ;;  %v149_v26 = vmul.f32 0.033333335, %v148_v17 }
  0x87   :  { %v45_v30 = vmin.f32 %v43_v28, 1.0  ;;  %v53_v31 = vmin.f32 %v51_v29, 1.0  ;;  %v198_v29 = vmul.f32 0.033333335, %v197_v19 }
  0x89   :  { %270 = vset.pattern.permute.xlu0 %v286_v32  ;;  %93 = vperm.xlu1 %268, %v53_v31   ;;  %v57_v36 = vsub.f32 %v53_v31, %v45_v30 }
  0x8a   :  { %77 = vperm.xlu2 %266, %v45_v30   ;;  %116 = vperm.xlu0 %270, %v45_v30  }
  0x91   :  { %271 = vset.pattern.permute.xlu1 %v286_v32 }
  0x92   :  { %269 = vset.pattern.permute.xlu2 %v286_v32  ;;  %131 = vperm.xlu1 %271, %v52_v22  }
  0x93   :  { %272 = vset.pattern.permute.xlu0 %v287_v33  ;;  %112 = vperm.xlu2 %269, %v44_v21  }
  0x94   :  { %161 = vperm.xlu0 %272, %v44_v21  }
  0x9a   :  { %273 = vset.pattern.permute.xlu1 %v287_v33 }
  0x9b   :  { %135 = vperm.xlu2 %269, %v53_v31   ;;  %165 = vperm.xlu1 %273, %v45_v30  }
  0x9c   :  { %275 = vset.pattern.permute.xlu0 %v288_v34 }
  0x9d   :  { %210 = vperm.xlu0 %275, %v44_v21  }
  0xa3   :  { %274 = vset.pattern.permute.xlu2 %v287_v33  ;;  %276 = vset.pattern.permute.xlu1 %v288_v34 }
  0xa4   :  { %180 = vperm.xlu2 %274, %v52_v22   ;;  %214 = vperm.xlu1 %276, %v45_v30  }
  0xac   :  { %184 = vperm.xlu2 %274, %v53_v31   ;;  %277 = vset.pattern.permute.xlu1 %v285_v6 }
  0xad   :  { %60 = vperm.xlu1 %277, %v56_v35  }
  0xb4   :  { %278 = vset.pattern.permute.xlu2 %v286_v32 }
  0xb5   :  { %102 = vperm.xlu2 %278, %v56_v35   ;;  %65 = vperm.xlu1 %277, %v57_v36  }
  0xbd   :  { %281 = vset.pattern.permute.xlu2 %v287_v33  ;;  %279 = vset.pattern.permute.xlu1 %v286_v32 }
  0xbe   :  { %155 = vperm.xlu2 %281, %v57_v36   ;;  %106 = vperm.xlu1 %279, %v57_v36  }
  0xc6   :  { %283 = vset.pattern.permute.xlu2 %v288_v34  ;;  %280 = vset.pattern.permute.xlu1 %v287_v33 }
  0xc7   :  { %204 = vperm.xlu2 %283, %v57_v36   ;;  %151 = vperm.xlu1 %280, %v56_v35  }
  0xcf   :  { %233 = vperm.xlu2 %283, %v53_v31   ;;  %282 = vset.pattern.permute.xlu1 %v288_v34 }
  0xd0   :  { %200 = vperm.xlu1 %282, %v56_v35  }
  0xd8   :  { %229 = vperm.xlu1 %282, %v52_v22  }
  0xdb   :  { %v73_v37 = vpop.permute.xlu2 %72 }
  0xe4   :  { %v311_v38 = vpop.permute.xlu2 %77 }
  0xed   :  { %v113_v40 = vpop.permute.xlu2 %112 }
  0xf3   :  { %v89_v43 = vpop.permute.xlu0 %88 }
  0xf4   :  { %v96_v44 = vsel %vm317_vm0, %v73_v37, %v89_v43 }
  0xf5   :  { %v136_v45 = vpop.permute.xlu2 %135 }
  0xfb   :  { %v94_v46 = vpop.permute.xlu1 %93 }
  0xfc   :  { %v323_v47 = vpop.permute.xlu0 %116  ;;  %v97_v15 = vsel %vm317_vm0, %v311_v38, %v94_v46 }
  0xfd   :  { %v139_v16 = vsel %vm317_vm0, %v323_v47, %v136_v45 }
  0xfe   :  { %v181_v48 = vpop.permute.xlu2 %180  ;;  %v146_v23 = vsel %vm329_vm5, %v139_v16, %v97_v15 }
 0x104   :  { %v132_v50 = vpop.permute.xlu1 %131 }
 0x105   :  { %v138_v52 = vsel %vm317_vm0, %v113_v40, %v132_v50 }
 0x106   :  { %v145_v54 = vsel %vm329_vm5, %v138_v52, %v96_v44  ;;  %v185_v55 = vpop.permute.xlu2 %184  ;;  %v342_v56 = vpop.permute.xlu0 %161 }
 0x107   :  { %v187_v57 = vsel %vm317_vm0, %v342_v56, %v181_v48 }
 0x108   :  { %v349_v58 = vsel %vm336_vm6, %v187_v57, %v145_v54 }
 0x10d   :  { %v166_v61 = vpop.permute.xlu1 %165 }
 0x10e   :  { %v188_v18 = vsel %vm317_vm0, %v166_v61, %v185_v55 }
 0x10f   :  { %v103_v62 = vpop.permute.xlu2 %102  ;;  %v195_v25 = vsel %vm336_vm6, %v188_v18, %v146_v23  ;;  %v211_v54 = vpop.permute.xlu0 %210 }
 0x110   :  { %v109_v63 = vmul.f32 %v103_v62, %v100_v60 }
 0x112   :  { %v119_v0 = vadd.f32 %v113_v40, %v109_v63 }
 0x114   :  { %v121_v1 = vsel %vm317_vm0, %v119_v0, 0.33333334 }
 0x116   :  { %v215_v2 = vpop.permute.xlu1 %214 }
 0x118   :  { %v156_v3 = vpop.permute.xlu2 %155 }
 0x119   :  { %v159_v32 = vmul.f32 %v156_v3, %v149_v26 }
 0x11b   :  { %v169_v36 = vadd.f32 %v166_v61, %v159_v32 }
 0x11d   :  { %v171_v41 = vsel %vm317_vm0, %v169_v36, 0.6666667 }
 0x11f   :  { %v61_v6 = vpop.permute.xlu1 %60 }
 0x120   :  { %v68_v7 = vmul.f32 %v61_v6, %v55_v5 }
 0x121   :  { %v205_v8 = vpop.permute.xlu2 %204 }
 0x122   :  { %v80_v11 = vadd.f32 %v73_v37, %v68_v7  ;;  %v208_v33 = vmul.f32 %v205_v8, %v198_v29 }
 0x124   :  { %v84_v13 = vsel %vm317_vm0, %v80_v11, 0.0  ;;  %v218_v37 = vadd.f32 %v215_v2, %v208_v33 }
 0x125   :  { %v128_v14 = vsel %vm357_vm9, %v121_v1, %v84_v13 }
 0x126   :  { %v220_v44 = vsel %vm317_vm0, %v218_v37, 1.0 }
 0x127   :  { %v66_v20 = vpop.permute.xlu1 %65 }
 0x128   :  { %v69_v21 = vmul.f32 %v66_v20, %v55_v5 }
 0x129   :  { %v234_v24 = vpop.permute.xlu2 %233 }
 0x12a   :  { %v81_v27 = vadd.f32 %v311_v38, %v69_v21  ;;  %v237_v28 = vsel %vm317_vm0, %v215_v2, %v234_v24 }
 0x12b   :  { %v244_v30 = vsel %vm376_vm12, %v237_v28, %v195_v25 }
 0x12c   :  { %v85_v31 = vsel %vm317_vm0, %v81_v27, 0.0  ;;  %249 = vst.msk [vmem:[%s432_s2 + $0x8] sm:$0xff] %vm247_vm13, %v244_v30 }
 0x130   :  { %v107_v34 = vpop.permute.xlu1 %106 }
 0x131   :  { %v110_v35 = vmul.f32 %v107_v34, %v100_v60 }
 0x133   :  { %v120_v38 = vadd.f32 %v323_v47, %v110_v35 }
 0x135   :  { %v122_v40 = vsel %vm317_vm0, %v120_v38, 0.33333334 }
 0x136   :  { %v129_v43 = vsel %vm357_vm9, %v122_v40, %v85_v31 }
 0x137   :  { %v178_v45 = vsel %vm174_vm1, %v171_v41, %v129_v43 }
 0x138   :  { %v227_v46 = vsel %vm221_vm2, %v220_v44, %v178_v45 }
 0x139   :  { %v152_v47 = vpop.permute.xlu1 %151  ;;  %246 = vst [vmem:[%s433_s1 + $0x8] sm:$0xff] %v227_v46 }
 0x13a   :  { %v158_v48 = vmul.f32 %v152_v47, %v149_v26 }
 0x13c   :  { %v168_v49 = vadd.f32 %v342_v56, %v158_v48 }
 0x13e   :  { %v170_v50 = vsel %vm317_vm0, %v168_v49, 0.6666667 }
 0x13f   :  { %v177_v51 = vsel %vm174_vm1, %v170_v50, %v128_v14 }
 0x142   :  { %v201_v52 = vpop.permute.xlu1 %200 }
 0x143   :  { %v207_v53 = vmul.f32 %v201_v52, %v198_v29 }
 0x145   :  { %v217_v55 = vadd.f32 %v211_v54, %v207_v53 }
 0x147   :  { %v219_v57 = vsel %vm317_vm0, %v217_v55, 1.0 }
 0x148   :  { %v226_v59 = vsel %vm221_vm2, %v219_v57, %v177_v51 }
 0x149   :  { %245 = vst [vmem:[%s433_s1] sm:$0xff] %v226_v59 }
 0x14a   :  { %v230_v60 = vpop.permute.xlu1 %229 }
 0x14b   :  { %v236_v56 = vsel %vm317_vm0, %v211_v54, %v230_v60 }
 0x14c   :  { %v243_v61 = vsel %vm376_vm12, %v236_v56, %v349_v58 }
 0x14d   :  { %248 = vst.msk [vmem:[%s432_s2] sm:$0xff] %vm247_vm13, %v243_v61 }

</bundles_post_ra>
